<compile_context>
chip_gen: v6e
topology: v6e:2x2x1
jax: 0.10.0
libtpu: 0.0.40
codegen_flags: <defaults>
</compile_context>

<pallas_src>
import jax
import jax.numpy as jnp
from jax.experimental import pallas as pl
from jax.experimental.pallas import tpu as pltpu


def _cdiv(a, b):
    return -(-a // b)


def _round_up(n, m):
    return ((n + m - 1) // m) * m


def _encoder_kernel(x_ref, w1_ref, b1_ref, w2_ref, b2_ref, o_ref):
    # hidden = relu(x @ W1 + b1)   -- MXU matmul (f32), VPU bias-add + relu
    h = jnp.dot(x_ref[...], w1_ref[...], preferred_element_type=jnp.float32)
    h = jnp.maximum(h + b1_ref[...], 0.0)
    # mu = hidden @ W2 + b2        -- second MXU matmul, f32 epilogue
    mu = jnp.dot(h, w2_ref[...], preferred_element_type=jnp.float32)
    o_ref[...] = (mu + b2_ref[...]).astype(o_ref.dtype)
    # TODO(synk): var_encoder / logvar / eps = randn_like(std) in the torch
    # forward are dead code w.r.t. the returned value (x_sample = mu) and are
    # intentionally omitted.


def _vmem_estimate_bytes(tm, k, h, n):
    """Rough VMEM footprint (f32, default 2-deep BlockSpec buffering)."""
    itemsize = 4
    x_b = 2 * tm * k * itemsize                    # x tiles, double-buffered
    o_b = 2 * tm * n * itemsize                    # out tiles, double-buffered
    w_b = 2 * (k * h + h * n + h + n) * itemsize   # weights / biases
    h_b = tm * h * itemsize                        # hidden activations
    return x_b + o_b + w_b + h_b


def encoder_forward(x, w1, b1, w2, b2, *, block_m=1024,
                    vmem_budget_bytes=40 << 20):
    """x: (B, input_dim) f32 -> mu: (B, latent_dim) f32.

    w1: (input_dim, hidden_dim)   (== torch W1.T)
    b1: (hidden_dim,)
    w2: (hidden_dim, latent_dim)  (== torch W2.T)
    b2: (latent_dim,)
    """
    B, K = x.shape
    Kw, H = w1.shape
    Hw, N = w2.shape
    assert Kw == K and Hw == H and b1.shape == (H,) and b2.shape == (N,)

    SUB = 8  # f32 sublane width

    # --- batch tile selection -------------------------------------------------
    #  * cap at block_m (bigger tiles amortize per-grid-step overhead)
    #  * force >= 2 grid steps once B is splittable on an 8-row boundary, so the
    #    "parallel" batch axis can shard across both v7x TensorCores
    #  * shrink until the double-buffered VMEM estimate fits the budget
    tm = min(block_m,
             _round_up(B, SUB),
             max(SUB, _round_up(_cdiv(B, 2), SUB)))
    while tm > SUB and _vmem_estimate_bytes(tm, K, H, N) > vmem_budget_bytes:
        tm = max(SUB, _round_up(tm // 2, SUB))
    grid_m = _cdiv(B, tm)

    # Biases as (1, dim) rows (free reshape; broadcast-added in the kernel).
    b1r = jnp.reshape(b1, (1, H))
    b2r = jnp.reshape(b2, (1, N))

    cp_kwargs = dict(dimension_semantics=("parallel",))
    est = _vmem_estimate_bytes(tm, K, H, N)
    if est > (12 << 20):
        # Above v5e's 16 MiB scoped default: raise explicitly, but stay well
        # under v7x's 64 MiB physical VMEM.
        cp_kwargs["vmem_limit_bytes"] = int(min(2 * est, 48 << 20))

    out = pl.pallas_call(
        _encoder_kernel,
        out_shape=jax.ShapeDtypeStruct((B, N), x.dtype),
        grid=(grid_m,),
        in_specs=[
            # x tiles stream along the batch axis (double-buffered by
            # BlockSpec); a ragged last block is masked by Pallas, so no
            # host-side padding pass over x is needed.
            pl.BlockSpec((tm, K), lambda i: (i, 0)),
            # weights / biases: constant index_map -> fetched once and held
            # VMEM-resident across all grid steps.  Their block shapes equal
            # the full array dims, so no padding is required.
            pl.BlockSpec((K, H), lambda i: (0, 0)),
            pl.BlockSpec((1, H), lambda i: (0, 0)),
            pl.BlockSpec((H, N), lambda i: (0, 0)),
            pl.BlockSpec((1, N), lambda i: (0, 0)),
        ],
        # Exact (B, N) output: no lane padding, no trailing slice pass.
        out_specs=pl.BlockSpec((tm, N), lambda i: (i, 0)),
        compiler_params=pltpu.CompilerParams(**cp_kwargs),
    )(x, w1, b1r, w2, b2r)
    return out


def _reference(x, w1, b1, w2, b2):
    h = jnp.maximum(
        jnp.dot(x, w1, precision=jax.lax.Precision.HIGHEST) + b1[None, :], 0.0)
    return jnp.dot(h, w2, precision=jax.lax.Precision.HIGHEST) + b2[None, :]


if __name__ == "__main__":
    input_dim, hidden_dim, latent_dim = 8, 64, 10
    batch = 16

    key = jax.random.PRNGKey(0)
    kx, k1, k2, k3, k4 = jax.random.split(key, 5)

    # Deterministic inputs / params (uniform, roughly torch's default scale).
    bound1 = 1.0 / input_dim ** 0.5
    bound2 = 1.0 / hidden_dim ** 0.5
    x = jax.random.normal(kx, (batch, input_dim), dtype=jnp.float32)
    w1 = jax.random.uniform(k1, (input_dim, hidden_dim), jnp.float32, -bound1, bound1)
    b1 = jax.random.uniform(k2, (hidden_dim,), jnp.float32, -bound1, bound1)
    w2 = jax.random.uniform(k3, (hidden_dim, latent_dim), jnp.float32, -bound2, bound2)
    b2 = jax.random.uniform(k4, (latent_dim,), jnp.float32, -bound2, bound2)

    mu = encoder_forward(x, w1, b1, w2, b2)
    mu = jax.block_until_ready(mu)

    ref = _reference(x, w1, b1, w2, b2)
    assert mu.shape == (batch, latent_dim), mu.shape
    # f32 in-kernel matmuls vs. HIGHEST-precision XLA reference; tolerance left
    # with headroom for MXU precision-mode differences across generations.
    err = float(jnp.max(jnp.abs(mu - ref)))
    assert jnp.allclose(mu, ref, atol=2e-2, rtol=2e-2), err
    print("KERNEL_OK")
</pallas_src>

<mosaic_0001>
module attributes {stable_mosaic.version = 11 : i64} {
  func.func @_encoder_kernel(%arg0: i32, %arg1: memref<8x8xf32, #tpu.memory_space<vmem>>, %arg2: memref<8x64xf32, #tpu.memory_space<vmem>>, %arg3: memref<1x64xf32, #tpu.memory_space<vmem>>, %arg4: memref<64x10xf32, #tpu.memory_space<vmem>>, %arg5: memref<1x10xf32, #tpu.memory_space<vmem>>, %arg6: memref<8x10xf32, #tpu.memory_space<vmem>>) attributes {dimension_semantics = [#tpu.dimension_semantics<parallel>], iteration_bounds = array<i64: 2>, scalar_prefetch = 0 : i64, scratch_operands = 0 : i64, tpu.core_type = #tpu.core_type<tc>, window_params = [{transform_indices = @transform_0, window_bounds = array<i64: 8, 8>}, {pipeline_mode = #tpu.pipeline_mode<synchronous>, transform_indices = @transform_1, window_bounds = array<i64: 8, 64>}, {pipeline_mode = #tpu.pipeline_mode<synchronous>, transform_indices = @transform_2, window_bounds = array<i64: 1, 64>}, {pipeline_mode = #tpu.pipeline_mode<synchronous>, transform_indices = @transform_3, window_bounds = array<i64: 64, 10>}, {pipeline_mode = #tpu.pipeline_mode<synchronous>, transform_indices = @transform_4, window_bounds = array<i64: 1, 10>}, {transform_indices = @transform_5, window_bounds = array<i64: 8, 10>}]} {
    %c0 = arith.constant 0 : index
    %c0_0 = arith.constant 0 : index
    %0 = vector.load %arg1[%c0, %c0_0] : memref<8x8xf32, #tpu.memory_space<vmem>>, vector<8x8xf32>
    %c0_1 = arith.constant 0 : index
    %c0_2 = arith.constant 0 : index
    %1 = vector.load %arg2[%c0_1, %c0_2] : memref<8x64xf32, #tpu.memory_space<vmem>>, vector<8x64xf32>
    %cst = arith.constant dense<0.000000e+00> : vector<8x64xf32>
    %2 = tpu.matmul %0, %1, %cst {dimension_numbers = #tpu.dot_dimension_numbers<[1], [0], [0], [1], [0, 0, 1, 1], [], []>} : vector<8x8xf32>, vector<8x64xf32>, vector<8x64xf32> -> vector<8x64xf32>
    %c0_3 = arith.constant 0 : index
    %c0_4 = arith.constant 0 : index
    %3 = vector.load %arg3[%c0_3, %c0_4] : memref<1x64xf32, #tpu.memory_space<vmem>>, vector<1x64xf32>
    %4 = vector.broadcast %3 : vector<1x64xf32> to vector<8x64xf32>
    %5 = arith.addf %2, %4 : vector<8x64xf32>
    %cst_5 = arith.constant 0.000000e+00 : f32
    %6 = vector.broadcast %cst_5 : f32 to vector<8x64xf32>
    %7 = arith.maximumf %5, %6 : vector<8x64xf32>
    %c0_6 = arith.constant 0 : index
    %c0_7 = arith.constant 0 : index
    %8 = vector.load %arg4[%c0_6, %c0_7] : memref<64x10xf32, #tpu.memory_space<vmem>>, vector<64x10xf32>
    %cst_8 = arith.constant dense<0.000000e+00> : vector<8x10xf32>
    %9 = tpu.matmul %7, %8, %cst_8 {dimension_numbers = #tpu.dot_dimension_numbers<[1], [0], [0], [1], [0, 0, 1, 1], [], []>} : vector<8x64xf32>, vector<64x10xf32>, vector<8x10xf32> -> vector<8x10xf32>
    %c0_9 = arith.constant 0 : index
    %c0_10 = arith.constant 0 : index
    %10 = vector.load %arg5[%c0_9, %c0_10] : memref<1x10xf32, #tpu.memory_space<vmem>>, vector<1x10xf32>
    %11 = vector.broadcast %10 : vector<1x10xf32> to vector<8x10xf32>
    %12 = arith.addf %9, %11 : vector<8x10xf32>
    %c0_11 = arith.constant 0 : index
    %c0_12 = arith.constant 0 : index
    %13 = vector.load %arg6[%c0_11, %c0_12] : memref<8x10xf32, #tpu.memory_space<vmem>>, vector<8x10xf32>
    tpu.vector_store %arg6[%c0_11, %c0_12], %12 {strides = array<i32>} : memref<8x10xf32, #tpu.memory_space<vmem>>, vector<8x10xf32>,
    return
  }
  func.func @transform_0(%arg0: i32) -> (i32, i32) {
    %c0_i32 = arith.constant 0 : i32
    %c0_i32_0 = arith.constant 0 : i32
    return %arg0, %c0_i32 : i32, i32
  }
  func.func @transform_1(%arg0: i32) -> (i32, i32) {
    %c0_i32 = arith.constant 0 : i32
    %c0_i32_0 = arith.constant 0 : i32
    %c0_i32_1 = arith.constant 0 : i32
    return %c0_i32, %c0_i32_0 : i32, i32
  }
  func.func @transform_2(%arg0: i32) -> (i32, i32) {
    %c0_i32 = arith.constant 0 : i32
    %c0_i32_0 = arith.constant 0 : i32
    %c0_i32_1 = arith.constant 0 : i32
    return %c0_i32, %c0_i32_0 : i32, i32
  }
  func.func @transform_3(%arg0: i32) -> (i32, i32) {
    %c0_i32 = arith.constant 0 : i32
    %c0_i32_0 = arith.constant 0 : i32
    %c0_i32_1 = arith.constant 0 : i32
    return %c0_i32, %c0_i32_0 : i32, i32
  }
  func.func @transform_4(%arg0: i32) -> (i32, i32) {
    %c0_i32 = arith.constant 0 : i32
    %c0_i32_0 = arith.constant 0 : i32
    %c0_i32_1 = arith.constant 0 : i32
    return %c0_i32, %c0_i32_0 : i32, i32
  }
  func.func @transform_5(%arg0: i32) -> (i32, i32) {
    %c0_i32 = arith.constant 0 : i32
    %c0_i32_0 = arith.constant 0 : i32
    return %arg0, %c0_i32 : i32, i32
  }
}

</mosaic_0001>

<bundles_post_ra>
// kernel: tpu_custom_call.1
= control target key start
LH: loop header
LB: loop body
LE: loop exit
PB: predicated region body
PF: predicated region fallthrough
CT: control target
= control target key end

     0   :  { %10 = vsyncpa [#allocation3], 0  ;;  %s779_s0 = inlined_call_operand.vmem [shape: f32[16,8], index: 0, kind: input, shape index: {}]   ;;  %s780_s1 = inlined_call_operand.vmem [shape: f32[8,64], index: 1, kind: input, shape index: {}]   ;;  %s781_s2 = inlined_call_operand.vmem [shape: f32[1,64], index: 2, kind: input, shape index: {}]   ;;  %s782_s3 = inlined_call_operand.vmem [shape: f32[64,10], index: 3, kind: input, shape index: {}]   ;;  %s783_s4 = inlined_call_operand.vmem [shape: f32[1,10], index: 4, kind: input, shape index: {}]   ;;  %s784_s5 = inlined_call_operand.hbm [shape: f32[16,10], index: 5, kind: output, shape index: {}]  }
   0x1   :  { %12 = vsyncpa [#allocation3 + $0x1], 0  ;;  %s653_s18 = smov 0   ;;  %s655_s19 = smov 0  }
   0x2   :  { %s657_s20 = smov 0   ;;  %s659_s21 = smov 0  }
   0x3 LB: > { %s674_s22 = sadd.s32 4294967295, %s618_s21   ;;  %s468_s23 = sadd.s32 4294967294, %s618_s21   ;;  %s618_s21 = sphi %s659_s21, %s790_s21   ;;  %s614_s20 = sphi %s657_s20, %s789_s20   ;;  %s610_s19 = sphi %s655_s19, %s788_s19   ;;  %s606_s18 = sphi %s653_s18, %s787_s18  }
   0x4   : > { %s678_s24 = sadd.s32 1, %s618_s21   ;;  %s135_s25 = sadd.s32 1, %s614_s20 }
   0x5   : > { %s132_s26 = ssub.s32 %s618_s21, %s678_s24  ;;  %p145_p0 = scmp.ne.s32.totalorder %s614_s20, %s610_s19 }
   0x6   : > { %p133_p1 = scmp.eq.s32.totalorder %s132_s26, 0  ;;  %p146_p2 = scmp.eq.s32.totalorder %s674_s22, 1 }
   0x7   : > { %p151_p3 = scmp.ne.s32.totalorder %s610_s19, %s606_s18  ;;  %p152_p4 = scmp.eq.s32.totalorder %s468_s23, 1 }
   0x8   : > { %s689_s27 = scalar_select %p133_p1, %s614_s20, %s135_s25  }
   0x9   : > { %p691_p5 = por %p146_p2, %p145_p0  ;;  %p695_p6 = por %p152_p4, %p151_p3 }
   0xa   : > { %p471_p7 = scmp.ge.s32.totalorder %s618_s21, 1  ;;  %p189_p8 = scmp.lt.s32.totalorder %s618_s21, 3 }
   0xc   : > { %p190_p9 = pnand %p471_p7, %p189_p8 }
   0xd   : > { %p216_p10 = scmp.lt.s32.totalorder (!%p190_p9), %s674_s22, 1  ;;  %s213_s14 = sand.u32 (!%p190_p9), 1, %s610_s19  }
   0xe   : > { %193 = sbr.rel (%p190_p9) target bundleno = 429 (0x1ad), region = 40  ;;  %s472_s15 = sshll.u32 (!%p190_p9), %s213_s14, 3 }
   0xf   : > { %s479_s23 = sshll.u32 (!%p190_p9), %s674_s22, 7  ;;  %s215_s25 = scalar_lea.vmem (!%p190_p9), [#allocation2], %s472_s15 }
  0x10   : > { %s409_s26 = sshll.u32 (!%p190_p9), %s215_s25, 4  ;;  %s744_s7 = scalar_lea.hbm (!%p190_p9), %s784_s5, %s479_s23  ;;  %s410_s26 = int_to_ptr.vmem [resolvable:$true] %s409_s26 }
  0x11   : > { %s396_s8 = scalar_lea.sflag (!%p190_p9), [#allocation3], %s213_s14 }
  0x13   : > { %v221_v0 = vld [vmem:[%s780_s1] sm:$0xff]  ;;  %v311_v1 = vld [vmem:[%s782_s3 + $0x38] sm:$0xff]  ;;  %v620_v2 = vmov 0.0   ;;  %vm621_vm0 = vmmov 0   ;;  %s217_s9 = scalar_select %p216_p10, %s674_s22, 1  ;;  %v310_v3 = vld [vmem:[%s782_s3 + $0x30] sm:$0xff] }
  0x14   : > { %493 = vmatprep.subr.mxu0 %v620_v2  ;;  %495 = vmatprep.mubr.msk.f32.mxu0 %vm621_vm0, %v620_v2  ;;  %vm229_vm1 = vcmask 64512   ;;  %v309_v4 = vld [vmem:[%s782_s3 + $0x28] sm:$0xff]  ;;  %v308_v6 = vld [vmem:[%s782_s3 + $0x20] sm:$0xff]  ;;  %v307_v7 = vld [vmem:[%s782_s3 + $0x18] sm:$0xff]  ;;  %vm319_vm2 = vcmask 523264   ;;  %vm393_vm3 = vcmask 80896  }
  0x15   : > { %494 = vmatpush3.msra.mxu0 %v221_v0  ;;  %498 = vmatprep.subr.mxu1 %v620_v2  ;;  %s473_s12 = sshll.u32 %s217_s9, 3  ;;  %v306_v8 = vld [vmem:[%s782_s3 + $0x10] sm:$0xff]  ;;  %v305_v9 = vld [vmem:[%s782_s3 + $0x8] sm:$0xff]  ;;  %v304_v10 = vld [vmem:[%s782_s3] sm:$0xff]  ;;  %s558_s9 = scalar_lea.vmem %s410_s26, 128 }
  0x16   : > { %499 = vmatpush3.msra.mxu1 %v311_v1  ;;  %514 = vmatprep.mubr.msk.f32.mxu1 %vm621_vm0, %v620_v2  ;;  %s219_s17 = scalar_lea.vmem %s779_s0, %s473_s12  ;;  %v474_v11 = vld [vmem:[%s781_s2] ss:$0 sm:$0xff]  ;;  %p559_p11 = scmp.ne.s32.totalorder %s410_s26, %s558_s9 }
  0x17   : > { %500 = vmatprep.subr.mxu1 %v620_v2  ;;  %v220_v5 = vld [vmem:[%s219_s17] sm:$0xff]  ;;  %s622_s22 = smov [#allocation2]  }
  0x18   : > { %501 = vmatpush3.msra.mxu1 %v310_v3  ;;  %496 = vmatmul.mubr.msk.f32.vlgmr.msra.gmra.mxu0 %vm229_vm1, %v220_v5  ;;  %v476_v16 = vld [vmem:[%s783_s4] ss:$0 sm:$0xff]  ;;  %p560_p12 = pnand %p559_p11, %p691_p5  ;;  %s562_s10 = sshll.u32 %s622_s22, 4  ;;  %s563_s10 = int_to_ptr.vmem [resolvable:$false] %s562_s10 }
  0x19   : > { %502 = vmatprep.subr.mxu1 %v620_v2  ;;  %s564_s11 = scalar_lea.vmem %s563_s10, 256  ;;  %p565_p0 = scmp.lt.s32.totalorder %s410_s26, %s563_s10 }
  0x1a   : > { %503 = vmatpush3.msra.mxu1 %v309_v4  ;;  %p561_p13 = pneg %p560_p12  ;;  %p566_p1 = scmp.lt.s32.totalorder %s564_s11, %s558_s9 }
  0x1b   : > { %504 = vmatprep.subr.mxu1 %v620_v2 }
  0x1c   : > { %505 = vmatpush3.msra.mxu1 %v308_v6  ;;  %p567_p2 = por %p566_p1, %p565_p0 }
  0x1d   : > { %506 = vmatprep.subr.mxu1 %v620_v2 }
  0x1e   : > { %507 = vmatpush3.msra.mxu1 %v307_v7  ;;  %p568_p3 = pnand %p567_p2, %p561_p13 }
  0x1f   : > { %508 = vmatprep.subr.mxu1 %v620_v2 }
  0x20   : > { %509 = vmatpush3.msra.mxu1 %v306_v8 }
  0x21   : > { %510 = vmatprep.subr.mxu1 %v620_v2 }
  0x22   : > { %511 = vmatpush3.msra.mxu1 %v305_v9 }
  0x23   : > { %512 = vmatprep.subr.mxu1 %v620_v2 }
  0x24   : > { %513 = vmatpush3.msra.mxu1 %v304_v10 }
  0xd8   : > { %v299_v12 = vpop.f32.mrf.mxu0 }
  0xd9   : > { %v300_v13 = vadd.f32 %v474_v11, %v299_v12 }
  0xda   : > { %v497_v14 = vpop.f32.mrf.mxu0 }
  0xdb   : > { %v303_v15 = vmax.f32 %v300_v13, 0.0 }
  0xdd   : > { %515 = vmatmul.mubr.msk.f32.vlgmr.msra.gmra.mxu1 %vm319_vm2, %v303_v15 }
 0x19d   : > { %v389_v17 = vpop.f32.mrf.mxu1 }
 0x19e   : > { %v390_v18 = vadd.f32 %v476_v16, %v389_v17 }
 0x19f   : > { %v516_v19 = vpop.f32.mrf.mxu1 }
 0x1a0   : > { %394 = vst.msk [vmem:[%s215_s25] sm:$0xff] %vm393_vm3, %v390_v18 }
 0x1a1   : > { %571 = shalt.err (!%p568_p3)
}
 0x1a2   : > { %s572_s12 = scalar_lea.hbm %s744_s7, 128  ;;  %s576_s15 = scalar_lea.hbm %s784_s5, 256 }
 0x1a3   : > { %p573_p4 = scmp.ne.s32.totalorder %s744_s7, %s572_s12  ;;  %p577_p9 = scmp.lt.s32.totalorder %s744_s7, %s784_s5 }
 0x1a4   : > { %p578_p10 = scmp.lt.s32.totalorder %s576_s15, %s572_s12 }
 0x1a5   : > { %p574_p7 = pnand %p573_p4, %p691_p5 }
 0x1a6   : > { %p579_p11 = por %p578_p10, %p577_p9 }
 0x1a7   : > { %p575_p8 = pneg %p574_p7 }
 0x1a9   : > { %p580_p12 = pnand %p579_p11, %p575_p8 }
 0x1ab   : > { %583 = shalt.err (!%p580_p12)
}
 0x1ac   : > { %517 = dma.vmem_to_hbm [thread:$0]  (%p691_p5), %s410_s26, 128, %s744_s7, %s396_s8  }
 0x1ad PF: > { %p523_p13 = scmp.ge.s32.totalorder %s618_s21, 2  ;;  %s421_s23 = sand.u32 1, %s606_s18  }
 0x1ae   : > { %s422_s25 = scalar_lea.sflag [#allocation3], %s421_s23 }
 0x1af   : > { %p520_p0 = pnand %p523_p13, %p695_p6 }
 0x1b1   : > { %p521_p1 = pneg %p520_p0 }
 0x1b3   : > { %601 = dma.done.wait (%p521_p1), %s422_s25, 128  }
 0x1b4   : > { %603 = vsyncadd (%p521_p1), %s422_s25, 4294967168  ;;  %p15_p2 = scmp.ge.s32.totalorder %s678_s24, 4   ;;  %s787_s18 = smov %s610_s19 }
 0x1b5   : > { %s788_s19 = smov %s614_s20  ;;  %s789_s20 = smov %s689_s27 }
 0x1b6   : > { %s790_s21 = smov %s678_s24  ;;  %17 = sbr.rel (!%p15_p2) target bundleno = 3 (0x3), region = 75 }
 0x1bb   :  { %427 = vsyncpa [#allocation3], 1 }
 0x1bc   :  { %429 = vsyncpa [#allocation3 + $0x1], 1 }

</bundles_post_ra>
